<compile_context>
chip_gen: v6e
topology: v6e:2x2x1
jax: 0.10.0
libtpu: 0.0.40
codegen_flags: <defaults>
</compile_context>

<pallas_src>
import functools

import jax
import jax.numpy as jnp
from jax.experimental import pallas as pl
from jax.experimental.pallas import tpu as pltpu


# --------------------------------------------------------------------------- #
# Kernel
# --------------------------------------------------------------------------- #
def _mlp_kernel(num_layers, compute_dtype, *refs):
    # refs = (x_ref, w1, b1, w2, b2, ..., wL, bL, o_ref)
    #
    # Ragged-last-tile note: the out-of-bounds lane columns of x_ref contain
    # garbage (stale VMEM).  This is safe because every op here is per-column
    # (matmul columns independent, bias/ReLU elementwise) and OOB stores are
    # discarded by Pallas.  Do NOT add any reduction/normalization over the
    # lane (batch) axis inside this kernel without masking first.
    x_ref = refs[0]
    o_ref = refs[-1]
    wb = refs[1:-1]

    h = x_ref[...].astype(compute_dtype)               # [D_in, tile_n]
    for li in range(num_layers):
        w = wb[2 * li][...]                            # [out, in], compute_dtype
        b = wb[2 * li + 1][...]                        # [out, 1],  f32
        # bf16 (or f32) MXU inputs, f32 accumulation; bias/ReLU stay in f32
        # (v5e has no bf16 VPU).  One down-cast per hidden layer boundary.
        y = jnp.dot(w, h, preferred_element_type=jnp.float32) + b
        if li != num_layers - 1:
            y = jnp.maximum(y, 0.0)
            h = y.astype(compute_dtype)                # bf16 between layers
        else:
            h = y                                      # last layer stays f32
    o_ref[...] = h.astype(o_ref.dtype)


# --------------------------------------------------------------------------- #
# Parameters
# --------------------------------------------------------------------------- #
def init_encoding_mlp_params(key, input_dim, output_dim, num_layers=4, num_neurons=64):
    """PyTorch nn.Linear-style init, stored feature-major: W [out, in], b [out, 1]."""
    assert num_layers >= 2
    dims = [input_dim] + [num_neurons] * (num_layers - 1) + [output_dim]
    params = []
    for i in range(num_layers):
        fan_in, fan_out = dims[i], dims[i + 1]
        key, kw, kb = jax.random.split(key, 3)
        bound = 1.0 / jnp.sqrt(jnp.float32(fan_in))
        w = jax.random.uniform(kw, (fan_out, fan_in), jnp.float32, -bound, bound)
        b = jax.random.uniform(kb, (fan_out, 1), jnp.float32, -bound, bound)
        params.append((w, b))
    return params


def fold_grid_encode_into_first_layer(params):
    """Fold the Grid-encoding rescale x/2 + 0.5 into layer 1 (offline, exact):
       W1 @ (x/2 + 0.5) + b1 == (W1/2) @ x + (b1 + 0.5*sum(W1, axis=1))."""
    (w1, b1), rest = params[0], params[1:]
    w1p = w1 * 0.5
    b1p = b1 + 0.5 * jnp.sum(w1, axis=1, keepdims=True)
    return [(w1p, b1p)] + list(rest)


# --------------------------------------------------------------------------- #
# Forward pass (feature-major, no wrapper transposes)
# --------------------------------------------------------------------------- #
def _round_up(x, m):
    return -(-int(x) // m) * m


def _default_min_grid_steps():
    # v7x has 2 TensorCores sharded over the "parallel" grid axis; keep >= 8
    # steps there so neither core idles.  Elsewhere 2 steps keeps pipelining.
    try:
        kind = jax.devices()[0].device_kind.lower()
        if "v7" in kind:
            return 8
    except Exception:  # pragma: no cover - defensive
        pass
    return 2


def encoding_mlp_forward_t(x_t, params, *, grid_encode=False, tile_n=4096,
                           min_grid_steps=None, use_bf16_matmul=True,
                           out_dtype=jnp.float32):
    """Feature-major forward: x_t [D_in, N] -> [D_out, N].  No HBM transposes.

    For the bf16 fast path, pass x_t already in bf16 (the [N, D] wrapper fuses
    the cast with its transpose) to halve activation DMA; f32 x_t also works
    (the kernel casts per-tile in VMEM).
    """
    if grid_encode:
        # Fold x/2 + 0.5 into layer 1 instead of an elementwise HBM pass.
        params = fold_grid_encode_into_first_layer(params)
    # Identity encoding: n_output_dims == input_dim, pass-through.

    D_in, N = x_t.shape
    num_layers = len(params)
    D_out = params[-1][0].shape[0]
    compute_dtype = jnp.bfloat16 if use_bf16_matmul else jnp.float32

    # --- Tile / grid selection --------------------------------------------
    tile_n = _round_up(max(int(tile_n), 128), 128)
    n_ceil = _round_up(N, 128)
    tile = min(tile_n, n_ceil)                          # never bigger than batch
    if min_grid_steps is None:
        min_grid_steps = _default_min_grid_steps()
    if min_grid_steps > 1:
        # Cap tile so the parallel grid keeps >= min_grid_steps steps.
        tile = min(tile, max(_round_up(pl.cdiv(N, min_grid_steps), 128), 128))
    grid = (pl.cdiv(N, tile),)                          # ragged last tile masked

    # --- Specs --------------------------------------------------------------
    in_specs = [pl.BlockSpec((D_in, tile), lambda i: (0, i))]
    flat_wb = []
    for (w, b) in params:
        w_c = w.astype(compute_dtype)                   # pre-cast: halves weight DMA
        in_specs.append(pl.BlockSpec(w_c.shape, lambda i: (0, 0)))   # VMEM-resident
        in_specs.append(pl.BlockSpec(b.shape, lambda i: (0, 0)))
        flat_wb.extend([w_c, b])
    out_spec = pl.BlockSpec((D_out, tile), lambda i: (0, i))         # lane-dense stores

    flops = 2 * N * sum(w.shape[0] * w.shape[1] for w, _ in params)
    bytes_accessed = (
        N * D_in * jnp.dtype(x_t.dtype).itemsize
        + N * D_out * jnp.dtype(out_dtype).itemsize
        + sum(w.size * jnp.dtype(compute_dtype).itemsize + b.size * 4
              for w, b in params)
    )

    out_t = pl.pallas_call(
        functools.partial(_mlp_kernel, num_layers, compute_dtype),
        out_shape=jax.ShapeDtypeStruct((D_out, N), out_dtype),
        grid_spec=pltpu.PrefetchScalarGridSpec(
            num_scalar_prefetch=0,
            grid=grid,
            in_specs=in_specs,
            out_specs=out_spec,
        ),
        compiler_params=pltpu.CompilerParams(
            dimension_semantics=("parallel",)),
        cost_estimate=pl.CostEstimate(flops=int(flops), transcendentals=0,
                                      bytes_accessed=int(bytes_accessed)),
    )(x_t, *flat_wb)

    return out_t                                        # [D_out, N]


def encoding_mlp_forward(x, params, *, grid_encode=False, tile_n=4096,
                         min_grid_steps=None, use_bf16_matmul=True,
                         out_dtype=jnp.float32):
    """Convenience batch-major wrapper: x [N, D_in] -> [N, D_out].

    The transpose to feature-major is fused with the bf16 down-cast so the
    unavoidable layout pass also halves activation DMA on the fast path.
    Prefer encoding_mlp_forward_t if the surrounding model can stay [D, N].
    """
    compute_dtype = jnp.bfloat16 if use_bf16_matmul else jnp.float32
    x_t = x.T.astype(compute_dtype)                     # fused transpose + cast
    out_t = encoding_mlp_forward_t(
        x_t, params, grid_encode=grid_encode, tile_n=tile_n,
        min_grid_steps=min_grid_steps, use_bf16_matmul=use_bf16_matmul,
        out_dtype=out_dtype)
    return out_t.T                                      # [N, D_out]


# --------------------------------------------------------------------------- #
# Reference
# --------------------------------------------------------------------------- #
def encoding_mlp_reference(x, params, grid_encode=False):
    if grid_encode:
        x = x / 2.0 + 0.5
    h = x
    for li, (w, b) in enumerate(params):                # nn.Linear: y = x @ W^T + b
        h = h @ w.T + b.T
        if li != len(params) - 1:
            h = jnp.maximum(h, 0.0)
    return h


# --------------------------------------------------------------------------- #
# Tests
# --------------------------------------------------------------------------- #
if __name__ == "__main__":
    # Small, module-consistent shapes: input_dim=4 (e.g. xyz+t), output_dim=3,
    # num_layers=4, num_neurons=32.
    input_dim, output_dim = 4, 3
    num_layers, num_neurons = 4, 32

    key = jax.random.PRNGKey(0)
    kx, kp = jax.random.split(key)
    params = init_encoding_mlp_params(kp, input_dim, output_dim,
                                      num_layers=num_layers,
                                      num_neurons=num_neurons)

    # 1) f32 MXU path, tight tolerance vs reference (batch-major wrapper).
    N = 256
    x = jax.random.uniform(kx, (N, input_dim), jnp.float32, -1.0, 1.0)
    y = jax.block_until_ready(encoding_mlp_forward(x, params, grid_encode=False,
                                                   use_bf16_matmul=False))
    y_ref = encoding_mlp_reference(x, params, grid_encode=False)
    assert y.shape == (N, output_dim)
    assert jnp.allclose(y, y_ref, atol=1e-5, rtol=1e-5), "f32 path mismatch vs reference"

    # 2) Multi-step grid with a ragged (masked) last tile, f32 path.
    N2 = 200
    x2 = jax.random.uniform(jax.random.fold_in(kx, 1), (N2, input_dim),
                            jnp.float32, -1.0, 1.0)
    y2 = jax.block_until_ready(encoding_mlp_forward(x2, params, tile_n=128,
                                                    min_grid_steps=1,
                                                    use_bf16_matmul=False))
    y2_ref = encoding_mlp_reference(x2, params)
    assert y2.shape == (N2, output_dim)
    assert jnp.allclose(y2, y2_ref, atol=1e-5, rtol=1e-5), "ragged-tile mismatch vs reference"

    # 3) Default fast path: bf16 input/activations, f32 accumulation (relaxed tol).
    y3 = jax.block_until_ready(encoding_mlp_forward(x, params))
    assert jnp.allclose(y3, y_ref, atol=5e-2, rtol=5e-2), "bf16 path mismatch vs reference"

    # 4) Feature-major entry point (no wrapper transposes) + bf16 output DMA.
    x_t = x.T.astype(jnp.bfloat16)
    y4_t = jax.block_until_ready(encoding_mlp_forward_t(x_t, params,
                                                        out_dtype=jnp.bfloat16))
    assert y4_t.shape == (output_dim, N)
    assert jnp.allclose(y4_t.T.astype(jnp.float32), y_ref, atol=5e-2, rtol=5e-2), \
        "feature-major bf16 path mismatch vs reference"

    # 5) grid_encode=True path: rescale folded into layer-1 weights (exact), f32.
    y5 = jax.block_until_ready(encoding_mlp_forward(x, params, grid_encode=True,
                                                    use_bf16_matmul=False))
    y5_ref = encoding_mlp_reference(x, params, grid_encode=True)
    assert jnp.allclose(y5, y5_ref, atol=1e-5, rtol=1e-5), "grid_encode fold mismatch"

    # TODO(synk): tcnn Grid/DenseGrid/HashGrid encodings (hash-table gather +
    # multiresolution interpolation) are not implemented; only the default
    # Identity encoding path is.
    print("KERNEL_OK")
</pallas_src>

<mosaic_0001>
module attributes {stable_mosaic.version = 11 : i64} {
  func.func @_mlp_kernel(%arg0: i32, %arg1: memref<4x128xf32, #tpu.memory_space<vmem>>, %arg2: memref<32x4xf32, #tpu.memory_space<vmem>>, %arg3: memref<32x1xf32, #tpu.memory_space<vmem>>, %arg4: memref<32x32xf32, #tpu.memory_space<vmem>>, %arg5: memref<32x1xf32, #tpu.memory_space<vmem>>, %arg6: memref<32x32xf32, #tpu.memory_space<vmem>>, %arg7: memref<32x1xf32, #tpu.memory_space<vmem>>, %arg8: memref<3x32xf32, #tpu.memory_space<vmem>>, %arg9: memref<3x1xf32, #tpu.memory_space<vmem>>, %arg10: memref<3x128xf32, #tpu.memory_space<vmem>>) attributes {dimension_semantics = [#tpu.dimension_semantics<parallel>], iteration_bounds = array<i64: 2>, scalar_prefetch = 0 : i64, scratch_operands = 0 : i64, tpu.core_type = #tpu.core_type<tc>, window_params = [{transform_indices = @transform_0, window_bounds = array<i64: 4, 128>}, {pipeline_mode = #tpu.pipeline_mode<synchronous>, transform_indices = @transform_1, window_bounds = array<i64: 32, 4>}, {pipeline_mode = #tpu.pipeline_mode<synchronous>, transform_indices = @transform_2, window_bounds = array<i64: 32, 1>}, {pipeline_mode = #tpu.pipeline_mode<synchronous>, transform_indices = @transform_3, window_bounds = array<i64: 32, 32>}, {pipeline_mode = #tpu.pipeline_mode<synchronous>, transform_indices = @transform_4, window_bounds = array<i64: 32, 1>}, {pipeline_mode = #tpu.pipeline_mode<synchronous>, transform_indices = @transform_5, window_bounds = array<i64: 32, 32>}, {pipeline_mode = #tpu.pipeline_mode<synchronous>, transform_indices = @transform_6, window_bounds = array<i64: 32, 1>}, {pipeline_mode = #tpu.pipeline_mode<synchronous>, transform_indices = @transform_7, window_bounds = array<i64: 3, 32>}, {pipeline_mode = #tpu.pipeline_mode<synchronous>, transform_indices = @transform_8, window_bounds = array<i64: 3, 1>}, {transform_indices = @transform_9, window_bounds = array<i64: 3, 128>}]} {
    %c0 = arith.constant 0 : index
    %c0_0 = arith.constant 0 : index
    %0 = vector.load %arg1[%c0, %c0_0] : memref<4x128xf32, #tpu.memory_space<vmem>>, vector<4x128xf32>
    %c0_1 = arith.constant 0 : index
    %c0_2 = arith.constant 0 : index
    %1 = vector.load %arg2[%c0_1, %c0_2] : memref<32x4xf32, #tpu.memory_space<vmem>>, vector<32x4xf32>
    %c0_3 = arith.constant 0 : index
    %c0_4 = arith.constant 0 : index
    %2 = vector.load %arg3[%c0_3, %c0_4] : memref<32x1xf32, #tpu.memory_space<vmem>>, vector<32x1xf32>
    %cst = arith.constant dense<0.000000e+00> : vector<32x128xf32>
    %3 = tpu.matmul %1, %0, %cst {dimension_numbers = #tpu.dot_dimension_numbers<[1], [0], [0], [1], [0, 0, 1, 1], [], []>} : vector<32x4xf32>, vector<4x128xf32>, vector<32x128xf32> -> vector<32x128xf32>
    %4 = vector.broadcast %2 : vector<32x1xf32> to vector<32x128xf32>
    %5 = arith.addf %3, %4 : vector<32x128xf32>
    %cst_5 = arith.constant 0.000000e+00 : f32
    %6 = vector.broadcast %cst_5 : f32 to vector<32x128xf32>
    %7 = arith.maximumf %5, %6 : vector<32x128xf32>
    %c0_6 = arith.constant 0 : index
    %c0_7 = arith.constant 0 : index
    %8 = vector.load %arg4[%c0_6, %c0_7] : memref<32x32xf32, #tpu.memory_space<vmem>>, vector<32x32xf32>
    %c0_8 = arith.constant 0 : index
    %c0_9 = arith.constant 0 : index
    %9 = vector.load %arg5[%c0_8, %c0_9] : memref<32x1xf32, #tpu.memory_space<vmem>>, vector<32x1xf32>
    %cst_10 = arith.constant dense<0.000000e+00> : vector<32x128xf32>
    %10 = tpu.matmul %8, %7, %cst_10 {dimension_numbers = #tpu.dot_dimension_numbers<[1], [0], [0], [1], [0, 0, 1, 1], [], []>} : vector<32x32xf32>, vector<32x128xf32>, vector<32x128xf32> -> vector<32x128xf32>
    %11 = vector.broadcast %9 : vector<32x1xf32> to vector<32x128xf32>
    %12 = arith.addf %10, %11 : vector<32x128xf32>
    %cst_11 = arith.constant 0.000000e+00 : f32
    %13 = vector.broadcast %cst_11 : f32 to vector<32x128xf32>
    %14 = arith.maximumf %12, %13 : vector<32x128xf32>
    %c0_12 = arith.constant 0 : index
    %c0_13 = arith.constant 0 : index
    %15 = vector.load %arg6[%c0_12, %c0_13] : memref<32x32xf32, #tpu.memory_space<vmem>>, vector<32x32xf32>
    %c0_14 = arith.constant 0 : index
    %c0_15 = arith.constant 0 : index
    %16 = vector.load %arg7[%c0_14, %c0_15] : memref<32x1xf32, #tpu.memory_space<vmem>>, vector<32x1xf32>
    %cst_16 = arith.constant dense<0.000000e+00> : vector<32x128xf32>
    %17 = tpu.matmul %15, %14, %cst_16 {dimension_numbers = #tpu.dot_dimension_numbers<[1], [0], [0], [1], [0, 0, 1, 1], [], []>} : vector<32x32xf32>, vector<32x128xf32>, vector<32x128xf32> -> vector<32x128xf32>
    %18 = vector.broadcast %16 : vector<32x1xf32> to vector<32x128xf32>
    %19 = arith.addf %17, %18 : vector<32x128xf32>
    %cst_17 = arith.constant 0.000000e+00 : f32
    %20 = vector.broadcast %cst_17 : f32 to vector<32x128xf32>
    %21 = arith.maximumf %19, %20 : vector<32x128xf32>
    %c0_18 = arith.constant 0 : index
    %c0_19 = arith.constant 0 : index
    %22 = vector.load %arg8[%c0_18, %c0_19] : memref<3x32xf32, #tpu.memory_space<vmem>>, vector<3x32xf32>
    %c0_20 = arith.constant 0 : index
    %c0_21 = arith.constant 0 : index
    %23 = vector.load %arg9[%c0_20, %c0_21] : memref<3x1xf32, #tpu.memory_space<vmem>>, vector<3x1xf32>
    %cst_22 = arith.constant dense<0.000000e+00> : vector<3x128xf32>
    %24 = tpu.matmul %22, %21, %cst_22 {dimension_numbers = #tpu.dot_dimension_numbers<[1], [0], [0], [1], [0, 0, 1, 1], [], []>} : vector<3x32xf32>, vector<32x128xf32>, vector<3x128xf32> -> vector<3x128xf32>
    %25 = vector.broadcast %23 : vector<3x1xf32> to vector<3x128xf32>
    %26 = arith.addf %24, %25 : vector<3x128xf32>
    %c0_23 = arith.constant 0 : index
    %c0_24 = arith.constant 0 : index
    %27 = vector.load %arg10[%c0_23, %c0_24] : memref<3x128xf32, #tpu.memory_space<vmem>>, vector<3x128xf32>
    tpu.vector_store %arg10[%c0_23, %c0_24], %26 {strides = array<i32>} : memref<3x128xf32, #tpu.memory_space<vmem>>, vector<3x128xf32>,
    return
  }
  func.func @transform_0(%arg0: i32) -> (i32, i32) {
    %c0_i32 = arith.constant 0 : i32
    %c0_i32_0 = arith.constant 0 : i32
    return %c0_i32, %arg0 : i32, i32
  }
  func.func @transform_1(%arg0: i32) -> (i32, i32) {
    %c0_i32 = arith.constant 0 : i32
    %c0_i32_0 = arith.constant 0 : i32
    %c0_i32_1 = arith.constant 0 : i32
    return %c0_i32, %c0_i32_0 : i32, i32
  }
  func.func @transform_2(%arg0: i32) -> (i32, i32) {
    %c0_i32 = arith.constant 0 : i32
    %c0_i32_0 = arith.constant 0 : i32
    %c0_i32_1 = arith.constant 0 : i32
    return %c0_i32, %c0_i32_0 : i32, i32
  }
  func.func @transform_3(%arg0: i32) -> (i32, i32) {
    %c0_i32 = arith.constant 0 : i32
    %c0_i32_0 = arith.constant 0 : i32
    %c0_i32_1 = arith.constant 0 : i32
    return %c0_i32, %c0_i32_0 : i32, i32
  }
  func.func @transform_4(%arg0: i32) -> (i32, i32) {
    %c0_i32 = arith.constant 0 : i32
    %c0_i32_0 = arith.constant 0 : i32
    %c0_i32_1 = arith.constant 0 : i32
    return %c0_i32, %c0_i32_0 : i32, i32
  }
  func.func @transform_5(%arg0: i32) -> (i32, i32) {
    %c0_i32 = arith.constant 0 : i32
    %c0_i32_0 = arith.constant 0 : i32
    %c0_i32_1 = arith.constant 0 : i32
    return %c0_i32, %c0_i32_0 : i32, i32
  }
  func.func @transform_6(%arg0: i32) -> (i32, i32) {
    %c0_i32 = arith.constant 0 : i32
    %c0_i32_0 = arith.constant 0 : i32
    %c0_i32_1 = arith.constant 0 : i32
    return %c0_i32, %c0_i32_0 : i32, i32
  }
  func.func @transform_7(%arg0: i32) -> (i32, i32) {
    %c0_i32 = arith.constant 0 : i32
    %c0_i32_0 = arith.constant 0 : i32
    %c0_i32_1 = arith.constant 0 : i32
    return %c0_i32, %c0_i32_0 : i32, i32
  }
  func.func @transform_8(%arg0: i32) -> (i32, i32) {
    %c0_i32 = arith.constant 0 : i32
    %c0_i32_0 = arith.constant 0 : i32
    %c0_i32_1 = arith.constant 0 : i32
    return %c0_i32, %c0_i32_0 : i32, i32
  }
  func.func @transform_9(%arg0: i32) -> (i32, i32) {
    %c0_i32 = arith.constant 0 : i32
    %c0_i32_0 = arith.constant 0 : i32
    return %c0_i32, %arg0 : i32, i32
  }
}

</mosaic_0001>

<bundles_post_ra>
// kernel: tpu_custom_call.1
= control target key start
LH: loop header
LB: loop body
LE: loop exit
PB: predicated region body
PF: predicated region fallthrough
CT: control target
= control target key end

     0   :  { %14 = vsyncpa [#allocation3], 0  ;;  %s1317_s0 = inlined_call_operand.vmem [shape: f32[4,256], index: 0, kind: input, shape index: {}]   ;;  %s1318_s1 = inlined_call_operand.vmem [shape: f32[32,4], index: 1, kind: input, shape index: {}]   ;;  %s1319_s2 = inlined_call_operand.vmem [shape: f32[32,1], index: 2, kind: input, shape index: {}]   ;;  %s1320_s3 = inlined_call_operand.vmem [shape: f32[32,32], index: 3, kind: input, shape index: {}]   ;;  %s1321_s4 = inlined_call_operand.vmem [shape: f32[32,1], index: 4, kind: input, shape index: {}]   ;;  %s1322_s5 = inlined_call_operand.vmem [shape: f32[32,32], index: 5, kind: input, shape index: {}]   ;;  %s1323_s6 = inlined_call_operand.vmem [shape: f32[32,1], index: 6, kind: input, shape index: {}]   ;;  %s1324_s7 = inlined_call_operand.vmem [shape: f32[3,32], index: 7, kind: input, shape index: {}]   ;;  %s1325_s8 = inlined_call_operand.vmem [shape: f32[3,1], index: 8, kind: input, shape index: {}]   ;;  %s1326_s9 = inlined_call_operand.hbm [shape: f32[3,256], index: 9, kind: output, shape index: {}]  }
   0x1   :  { %16 = vsyncpa [#allocation3 + $0x1], 0  ;;  %s1133_s30 = smov 0   ;;  %s1135_s10 = smov 0  }
   0x2   :  { %s1137_s11 = smov 0   ;;  %s1139_s12 = smov 0  }
   0x3 LB: > { %s1154_s13 = sadd.s32 4294967295, %s1077_s12   ;;  %s876_s14 = sadd.s32 4294967294, %s1077_s12   ;;  %s1077_s12 = sphi %s1139_s12, %s1332_s12   ;;  %s1073_s11 = sphi %s1137_s11, %s1331_s11   ;;  %s1069_s10 = sphi %s1135_s10, %s1330_s10   ;;  %s1065_s30 = sphi %s1133_s30, %s1329_s30  }
   0x4   : > { %s1158_s15 = sadd.s32 1, %s1077_s12   ;;  %s223_s16 = sadd.s32 1, %s1073_s11 }
   0x5   : > { %s220_s17 = ssub.s32 %s1077_s12, %s1158_s15  ;;  %p233_p0 = scmp.ne.s32.totalorder %s1073_s11, %s1069_s10 }
   0x6   : > { %p221_p1 = scmp.eq.s32.totalorder %s220_s17, 0  ;;  %p234_p2 = scmp.eq.s32.totalorder %s1154_s13, 1 }
   0x7   : > { %p239_p3 = scmp.ne.s32.totalorder %s1069_s10, %s1065_s30  ;;  %p240_p4 = scmp.eq.s32.totalorder %s876_s14, 1 }
   0x8   : > { %s1169_s18 = scalar_select %p221_p1, %s1073_s11, %s223_s16  }
   0x9   : > { %p1171_p5 = por %p234_p2, %p233_p0  ;;  %p1175_p6 = por %p240_p4, %p239_p3 }
   0xa   : > { %p879_p7 = scmp.ge.s32.totalorder %s1077_s12, 1  ;;  %p289_p8 = scmp.lt.s32.totalorder %s1077_s12, 3 }
   0xc   : > { %p290_p9 = pnand %p879_p7, %p289_p8 }
   0xd   : > { %p324_p10 = scmp.lt.s32.totalorder (!%p290_p9), %s1154_s13, 1  ;;  %s897_s17 = sshll.u32 (!%p290_p9), %s1154_s13, 6 }
   0xe   : > { %293 = sbr.rel (%p290_p9) target bundleno = 860 (0x35c), region = 56  ;;  %s1282_s26 = scalar_lea.hbm (!%p290_p9), %s1326_s9, %s897_s17 }
  0x13   : > { %v329_v0 = vld [vmem:[%s1318_s1] sm:$0xff]  ;;  %vm357_vm0 = vcmask 31744   ;;  %v336_v1 = vld [vmem:[%s1319_s2 + $0x18] sm:$0xff]  ;;  %s325_s25 = scalar_select %p324_p10, %s1154_s13, 1  ;;  %v1079_v2 = vmov 0   ;;  %v334_v3 = vld [vmem:[%s1319_s2 + $0x8] sm:$0xff] }
  0x14   : > { %928 = vmatprep.mubr.msk.f32.mxu0 %vm357_vm0, %v329_v0  ;;  %1015 = vset.pattern.permute.xlu0 %v1079_v2  ;;  %vm370_vm1 = vcmask 1043456   ;;  %v335_v4 = vld [vmem:[%s1319_s2 + $0x10] sm:$0xff]  ;;  %v333_v5 = vld [vmem:[%s1319_s2] sm:$0xff]  ;;  %v330_v7 = vld [vmem:[%s1318_s1 + $0x8] sm:$0xff]  ;;  %vm491_vm2 = vcmask 261120   ;;  %v1080_v59 = vmov 0.0  }
  0x15   : > { %1016 = vset.pattern.permute.xlu1 %v1079_v2  ;;  %354 = vperm.xlu0 %1015, %v336_v1   ;;  %s881_s28 = sshll.u32 %s325_s25, 2  ;;  %v331_v8 = vld [vmem:[%s1318_s1 + $0x10] sm:$0xff]  ;;  %v470_v9 = vld [vmem:[%s1321_s4 + $0x18] sm:$0xff]  ;;  %v468_v12 = vld [vmem:[%s1321_s4 + $0x8] sm:$0xff]  ;;  %vm1081_vm3 = vmmov 0   ;;  %s1082_s13 = smov [#allocation2]  }
  0x16   : > { %344 = vperm.xlu1 %1016, %v334_v3   ;;  %s327_s21 = scalar_lea.vmem %s1317_s0, %s881_s28  ;;  %v469_v10 = vld [vmem:[%s1321_s4 + $0x10] sm:$0xff]  ;;  %v332_v11 = vld [vmem:[%s1318_s1 + $0x18] sm:$0xff]  ;;  %v467_v13 = vld [vmem:[%s1321_s4] sm:$0xff]  ;;  %s321_s28 = sand.u32 1, %s1069_s10  }
  0x17   : > { %v328_v6 = vld [vmem:[%s327_s21] sm:$0xf]  ;;  %v600_v14 = vld [vmem:[%s1323_s6 + $0x18] sm:$0xff]  ;;  %v599_v15 = vld [vmem:[%s1323_s6 + $0x10] sm:$0xff]  ;;  %s880_s16 = sshll.u32 %s321_s28, 2  ;;  %s804_s25 = scalar_lea.sflag [#allocation3], %s321_s28 }
  0x18   : > { %926 = vmatprep.subr.msk.mxu0 %vm370_vm1, %v328_v6  ;;  %v598_v16 = vld [vmem:[%s1323_s6 + $0x8] sm:$0xff]  ;;  %v597_v17 = vld [vmem:[%s1323_s6] sm:$0xff]  ;;  %v465_v37 = vld [vmem:[%s1320_s3 + $0x10] sm:$0xff]  ;;  %s323_s21 = scalar_lea.vmem [#allocation2], %s880_s16  ;;  %s1021_s29 = sshll.u32 %s1082_s13, 4  ;;  %s1022_s29 = int_to_ptr.vmem [resolvable:$false] %s1021_s29 }
  0x19   : > { %349 = vperm.xlu0 %1015, %v335_v4   ;;  %927 = vmatpush3.msk.msra.mxu0 %vm370_vm1, %v328_v6  ;;  %v723_v18 = vld [vmem:[%s1325_s8] sm:$0x7]  ;;  %v464_v36 = vld [vmem:[%s1320_s3 + $0x8] sm:$0xff]  ;;  %v466_v38 = vld [vmem:[%s1320_s3 + $0x18] sm:$0xff]  ;;  %s817_s22 = sshll.u32 %s323_s21, 4  ;;  %s1023_s14 = scalar_lea.vmem %s1022_s29, 128  ;;  %s818_s22 = int_to_ptr.vmem [resolvable:$true] %s817_s22 }
  0x1a   : > { %339 = vperm.xlu1 %1016, %v333_v5   ;;  %929 = vmatmul.mubr.msk.f32.vlgmr.msra.gmra.mxu0 %vm357_vm0, %v330_v7  ;;  %v463_v19 = vld [vmem:[%s1320_s3] sm:$0xff]  ;;  %v594_v56 = vld [vmem:[%s1322_s5 + $0x8] sm:$0xff]  ;;  %v595_v57 = vld [vmem:[%s1322_s5 + $0x10] sm:$0xff]  ;;  %s1017_s27 = scalar_lea.vmem %s818_s22, 64  ;;  %p1024_p0 = scmp.lt.s32.totalorder %s818_s22, %s1022_s29 }
  0x1b   : > { %931 = vmatprep.mubr.msk.f32.mxu0 %vm357_vm0, %v331_v8  ;;  %942 = vmatprep.mubr.msk.f32.mxu1 %vm491_vm2, %v463_v19  ;;  %v593_v39 = vld [vmem:[%s1322_s5] sm:$0xff]  ;;  %v596_v58 = vld [vmem:[%s1322_s5 + $0x18] sm:$0xff]  ;;  %p1018_p11 = scmp.ne.s32.totalorder %s818_s22, %s1017_s27  ;;  %p1025_p1 = scmp.lt.s32.totalorder %s1023_s14, %s1017_s27 }
  0x1d   : > { %488 = vperm.xlu0 %1015, %v470_v9   ;;  %p1019_p12 = pnand %p1018_p11, %p1171_p5  ;;  %p1026_p2 = por %p1025_p1, %p1024_p0 }
  0x1e   : > { %483 = vperm.xlu1 %1016, %v469_v10   ;;  %932 = vmatmul.mubr.msk.f32.gmra.mxu0 %vm357_vm0, %v332_v11 }
  0x1f   : > { %956 = vmatprep.mubr.msk.f32.mxu0 %vm491_vm2, %v593_v39  ;;  %p1020_p13 = pneg %p1019_p12 }
  0x21   : > { %478 = vperm.xlu0 %1015, %v468_v12   ;;  %v722_v12 = vld [vmem:[%s1324_s7] sm:$0x7]  ;;  %p1027_p3 = pnand %p1026_p2, %p1020_p13 }
  0x22   : > { %473 = vperm.xlu1 %1016, %v467_v13  }
  0x25   : > { %618 = vperm.xlu0 %1015, %v600_v14  }
  0x26   : > { %613 = vperm.xlu1 %1016, %v599_v15  }
  0x29   : > { %608 = vperm.xlu0 %1015, %v598_v16  }
  0x2a   : > { %603 = vperm.xlu1 %1016, %v597_v17  }
  0x2d   : > { %726 = vperm.xlu0 %1015, %v723_v18  }
  0x90   : > { %v355_v20 = vpop.permute.xlu0 %354 }
  0x91   : > { %v345_v22 = vpop.permute.xlu1 %344 }
  0x94   : > { %v350_v26 = vpop.permute.xlu0 %349 }
  0x95   : > { %v340_v31 = vpop.permute.xlu1 %339 }
  0x98   : > { %v489_v40 = vpop.permute.xlu0 %488 }
  0x99   : > { %v484_v42 = vpop.permute.xlu1 %483 }
  0x9c   : > { %v479_v46 = vpop.permute.xlu0 %478 }
  0x9d   : > { %v474_v51 = vpop.permute.xlu1 %473 }
  0xa0   : > { %v619_v60 = vpop.permute.xlu0 %618 }
  0xa1   : > { %v614_v62 = vpop.permute.xlu1 %613 }
  0xa4   : > { %v609_v2 = vpop.permute.xlu0 %608 }
  0xa5   : > { %v604_v7 = vpop.permute.xlu1 %603 }
  0xa8   : > { %v727_v13 = vpop.permute.xlu0 %726 }
  0xda   : > { %v930_v21 = vpop.f32.mrf.mxu0 }
  0xdb   : > { %v446_v28 = vadd.f32 %v930_v21, %v345_v22 }
  0xdc   : > { %v440_v23 = vpop.f32.mrf.mxu0 }
  0xdd   : > { %v441_v32 = vadd.f32 %v440_v23, %v340_v31  ;;  %v460_v34 = vmax.f32 %v446_v28, 0.0 }
  0xde   : > { %v933_v24 = vpop.f32.mrf.mxu0 }
  0xdf   : > { %v456_v25 = vadd.f32 %v933_v24, %v355_v20  ;;  %v459_v35 = vmax.f32 %v441_v32, 0.0 }
  0xe0   : > { %v450_v27 = vpop.f32.mrf.mxu0 }
  0xe1   : > { %v462_v29 = vmax.f32 %v456_v25, 0.0  ;;  %v451_v30 = vadd.f32 %v450_v27, %v350_v26 }
  0xe3   : > { %v461_v33 = vmax.f32 %v451_v30, 0.0  ;;  %934 = vmatprep.subr.mxu1 %v462_v29 }
  0xe4   : > { %935 = vmatpush3.msra.mxu1 %v462_v29 }
  0xe5   : > { %936 = vmatprep.subr.mxu1 %v461_v33 }
  0xe6   : > { %937 = vmatpush3.msra.mxu1 %v461_v33 }
  0xe7   : > { %938 = vmatprep.subr.mxu1 %v460_v34 }
  0xe8   : > { %939 = vmatpush3.msra.mxu1 %v460_v34 }
  0xe9   : > { %940 = vmatprep.subr.mxu1 %v459_v35 }
  0xea   : > { %941 = vmatpush3.msra.mxu1 %v459_v35 }
  0xeb   : > { %943 = vmatmul.mubr.msk.f32.vlgmr.msra.gmra.mxu1 %vm491_vm2, %v464_v36  ;;  %962 = vmatprep.subr.mxu1 %v1080_v59 }
  0xec   : > { %945 = vmatprep.mubr.msk.f32.mxu1 %vm491_vm2, %v465_v37 }
  0xef   : > { %946 = vmatmul.mubr.msk.f32.gmra.mxu1 %vm491_vm2, %v466_v38 }
  0xf0   : > { %970 = vmatprep.mubr.msk.f32.mxu1 %vm1081_vm3, %v1080_v59 }
 0x1ab   : > { %v944_v41 = vpop.f32.mrf.mxu1 }
 0x1ac   : > { %v576_v48 = vadd.f32 %v944_v41, %v479_v46 }
 0x1ad   : > { %v570_v43 = vpop.f32.mrf.mxu1 }
 0x1ae   : > { %v571_v52 = vadd.f32 %v570_v43, %v474_v51  ;;  %v590_v54 = vmax.f32 %v576_v48, 0.0 }
 0x1af   : > { %v947_v44 = vpop.f32.mrf.mxu1 }
 0x1b0   : > { %v586_v45 = vadd.f32 %v947_v44, %v489_v40  ;;  %v589_v55 = vmax.f32 %v571_v52, 0.0 }
 0x1b1   : > { %v580_v47 = vpop.f32.mrf.mxu1 }
 0x1b2   : > { %v592_v49 = vmax.f32 %v586_v45, 0.0  ;;  %v581_v50 = vadd.f32 %v580_v47, %v484_v42 }
 0x1b4   : > { %v591_v53 = vmax.f32 %v581_v50, 0.0  ;;  %948 = vmatprep.subr.mxu0 %v592_v49 }
 0x1b5   : > { %949 = vmatpush3.msra.mxu0 %v592_v49 }
 0x1b6   : > { %950 = vmatprep.subr.mxu0 %v591_v53 }
 0x1b7   : > { %951 = vmatpush3.msra.mxu0 %v591_v53 }
 0x1b8   : > { %952 = vmatprep.subr.mxu0 %v590_v54 }
 0x1b9   : > { %953 = vmatpush3.msra.mxu0 %v590_v54 }
 0x1ba   : > { %954 = vmatprep.subr.mxu0 %v589_v55 }
 0x1bb   : > { %955 = vmatpush3.msra.mxu0 %v589_v55 }
 0x1bc   : > { %957 = vmatmul.mubr.msk.f32.vlgmr.msra.gmra.mxu0 %vm491_vm2, %v594_v56 }
 0x1bd   : > { %959 = vmatprep.mubr.msk.f32.mxu0 %vm491_vm2, %v595_v57 }
 0x1c0   : > { %960 = vmatmul.mubr.msk.f32.gmra.mxu0 %vm491_vm2, %v596_v58 }
 0x27c   : > { %v958_v61 = vpop.f32.mrf.mxu0 }
 0x27d   : > { %v705_v4 = vadd.f32 %v958_v61, %v609_v2 }
 0x27e   : > { %v699_v63 = vpop.f32.mrf.mxu0 }
 0x27f   : > { %v700_v8 = vadd.f32 %v699_v63, %v604_v7  ;;  %v719_v10 = vmax.f32 %v705_v4, 0.0 }
 0x280   : > { %v961_v0 = vpop.f32.mrf.mxu0 }
 0x281   : > { %v715_v1 = vadd.f32 %v961_v0, %v619_v60  ;;  %v718_v11 = vmax.f32 %v700_v8, 0.0 }
 0x282   : > { %v709_v3 = vpop.f32.mrf.mxu0 }
 0x283   : > { %v721_v5 = vmax.f32 %v715_v1, 0.0  ;;  %v710_v6 = vadd.f32 %v709_v3, %v614_v62 }
 0x285   : > { %v720_v9 = vmax.f32 %v710_v6, 0.0  ;;  %963 = vmatpush3.msra.mxu1 %v721_v5 }
 0x286   : > { %964 = vmatprep.subr.mxu1 %v1080_v59 }
 0x287   : > { %965 = vmatpush3.msra.mxu1 %v720_v9 }
 0x288   : > { %966 = vmatprep.subr.mxu1 %v1080_v59 }
 0x289   : > { %967 = vmatpush3.msra.mxu1 %v719_v10 }
 0x28a   : > { %968 = vmatprep.subr.mxu1 %v1080_v59 }
 0x28b   : > { %969 = vmatpush3.msra.mxu1 %v718_v11 }
 0x28c   : > { %971 = vmatmul.mubr.msk.f32.vlgmr.msra.gmra.mxu1 %vm491_vm2, %v722_v12 }
 0x34c   : > { %v798_v14 = vpop.f32.mrf.mxu1 }
 0x34d   : > { %v799_v15 = vadd.f32 %v798_v14, %v727_v13 }
 0x34e   : > { %v972_v16 = vpop.f32.mrf.mxu1 }
 0x34f   : > { %802 = vst [vmem:[%s323_s21] sm:$0x7] %v799_v15 }
 0x350   : > { %1030 = shalt.err (!%p1027_p3)
}
 0x351   : > { %s1031_s16 = scalar_lea.hbm %s1282_s26, 64  ;;  %s1035_s21 = scalar_lea.hbm %s1326_s9, 128 }
 0x352   : > { %p1032_p4 = scmp.ne.s32.totalorder %s1282_s26, %s1031_s16  ;;  %p1036_p9 = scmp.lt.s32.totalorder %s1282_s26, %s1326_s9 }
 0x353   : > { %p1037_p10 = scmp.lt.s32.totalorder %s1035_s21, %s1031_s16 }
 0x354   : > { %p1033_p7 = pnand %p1032_p4, %p1171_p5 }
 0x355   : > { %p1038_p11 = por %p1037_p10, %p1036_p9 }
 0x356   : > { %p1034_p8 = pneg %p1033_p7 }
 0x358   : > { %p1039_p12 = pnand %p1038_p11, %p1034_p8 }
 0x35a   : > { %1042 = shalt.err (!%p1039_p12)
}
 0x35b   : > { %973 = dma.vmem_to_hbm [thread:$0]  (%p1171_p5), %s818_s22, 64, %s1282_s26, %s804_s25  }
 0x35c PF: > { %p979_p13 = scmp.ge.s32.totalorder %s1077_s12, 2  ;;  %s829_s27 = sand.u32 1, %s1065_s30  }
 0x35d   : > { %s830_s13 = scalar_lea.sflag [#allocation3], %s829_s27 }
 0x35e   : > { %p976_p0 = pnand %p979_p13, %p1175_p6 }
 0x360   : > { %p977_p1 = pneg %p976_p0 }
 0x362   : > { %1060 = dma.done.wait (%p977_p1), %s830_s13, 64  }
 0x363   : > { %1062 = vsyncadd (%p977_p1), %s830_s13, 4294967232  ;;  %p19_p2 = scmp.ge.s32.totalorder %s1158_s15, 4   ;;  %s1329_s30 = smov %s1069_s10 }
 0x364   : > { %s1330_s10 = smov %s1073_s11  ;;  %s1331_s11 = smov %s1169_s18 }
 0x365   : > { %s1332_s12 = smov %s1158_s15  ;;  %21 = sbr.rel (!%p19_p2) target bundleno = 3 (0x3), region = 91 }
 0x36a   :  { %835 = vsyncpa [#allocation3], 1 }
 0x36b   :  { %837 = vsyncpa [#allocation3 + $0x1], 1 }

</bundles_post_ra>
